<compile_context>
chip_gen: v5e
topology: v5e:2x2
jax: 0.10.0
libtpu: 0.0.40
codegen_flags: <defaults>
</compile_context>

<pallas_src>
import functools

import jax
import jax.numpy as jnp
from jax.experimental import pallas as pl
from jax.experimental.pallas import tpu as pltpu


LANE = 128  # TPU vreg lane width / MXU-friendly alignment


def _round_up(n, m):
    return ((n + m - 1) // m) * m


def _num_tensorcores():
    """Tuning hint only (any value is functionally correct)."""
    try:
        kind = jax.devices()[0].device_kind.lower()
    except Exception:
        return 1
    if any(t in kind for t in ("v2", "v3", "v5 lite", "v5e", "v6 lite", "v6e")):
        return 1          # one TensorCore per JAX device
    return 2              # v4/v5p megacore, v7x dual-TC


def _choose_tiling(batch, num_cores):
    """Pick (b_pad, tb): both multiples of 128, b_pad % tb == 0."""
    b128 = _round_up(max(int(batch), 1), LANE)
    if num_cores >= 2:
        # Prefer >=2 grid steps so both TensorCores get work, modest tile size.
        for cand in (512, 256, 128):
            if b128 % cand == 0 and b128 // cand >= 2:
                return b128, cand
        return b128, b128                      # batch too small to split
    # Single TC: as few grid steps as possible (amortize ~0.35us/step).
    if b128 <= 1024:
        return b128, b128
    for cand in (1024, 512, 256, 128):
        if b128 % cand == 0:
            return b128, cand
    return b128, LANE


# --------------------------------------------------------------------------- #
# Kernel
# --------------------------------------------------------------------------- #
def _encoder_kernel(x_ref,
                    w1_ref, b1_ref,
                    w2_ref, b2_ref,
                    w3_ref, b3_ref,
                    w4_ref, b4_ref,
                    scores_ref):
    """Whole 4-layer MLP for one (tb, d0) batch tile.

    All feature dims are pre-padded to multiples of 128 so every MXU matmul is
    dense and the single output store is lane-dense.  Matmul inputs are in the
    compute dtype (bf16 by default), accumulation and biases are f32.
    """
    cdt = w1_ref.dtype

    h = jnp.dot(x_ref[...], w1_ref[...],
                preferred_element_type=jnp.float32) + b1_ref[...]
    h = jnp.maximum(h, 0.0).astype(cdt)

    h = jnp.dot(h, w2_ref[...],
                preferred_element_type=jnp.float32) + b2_ref[...]
    h = jnp.maximum(h, 0.0).astype(cdt)

    h = jnp.dot(h, w3_ref[...],
                preferred_element_type=jnp.float32) + b3_ref[...]
    h = jnp.maximum(h, 0.0).astype(cdt)

    s = jnp.dot(h, w4_ref[...],
                preferred_element_type=jnp.float32) + b4_ref[...]
    scores_ref[...] = s.astype(scores_ref.dtype)


# --------------------------------------------------------------------------- #
# Parameter preparation (run ONCE at init, not per forward call)
# --------------------------------------------------------------------------- #
def prepare_encoder_params(params, *, compute_dtype=jnp.bfloat16):
    """Pads weights/biases to lane-aligned shapes and casts weights once.

    Zero padding is numerically inert: padded input features hit zero weight
    rows, padded output columns get zero weights/bias.
    Returns (padded_arrays, real_dims) — pass the whole tuple to
    `encoder_forward`.
    """
    w1, b1, w2, b2, w3, b3, w4, b4 = params

    d0 = _round_up(w1.shape[0], LANE)   # 71      -> 128
    d1 = _round_up(w1.shape[1], LANE)   # 120     -> 128
    d2 = _round_up(w2.shape[1], LANE)   # 200     -> 256
    d3 = _round_up(w3.shape[1], LANE)   # 120     -> 128
    d4 = _round_up(w4.shape[1], LANE)   # 2*zdim  -> 128 (zdim=16)

    def pad2(a, rows, cols, dtype):
        return jnp.pad(
            a, ((0, rows - a.shape[0]), (0, cols - a.shape[1]))).astype(dtype)

    arrays = (
        pad2(w1, d0, d1, compute_dtype), pad2(b1, 1, d1, jnp.float32),
        pad2(w2, d1, d2, compute_dtype), pad2(b2, 1, d2, jnp.float32),
        pad2(w3, d2, d3, compute_dtype), pad2(b3, 1, d3, jnp.float32),
        pad2(w4, d3, d4, compute_dtype), pad2(b4, 1, d4, jnp.float32),
    )
    real_dims = (int(w1.shape[0]), int(w1.shape[1]), int(w2.shape[1]),
                 int(w3.shape[1]), int(w4.shape[1]))
    return arrays, real_dims


# --------------------------------------------------------------------------- #
# Forward pass
# --------------------------------------------------------------------------- #
@functools.partial(jax.jit, static_argnames=("zdim", "tb", "real_dims"))
def _encoder_forward_impl(x, arrays, *, zdim, tb, real_dims):
    w1p, b1p, w2p, b2p, w3p, b3p, w4p, b4p = arrays
    compute_dtype = w1p.dtype

    B, in_dim = x.shape
    d0 = w1p.shape[0]
    d4 = w4p.shape[1]
    out_dim = 2 * zdim

    # Batch padding (activation only; weights are pre-padded).
    b_pad = _round_up(B, tb)
    xp = jnp.pad(x, ((0, b_pad - B), (0, d0 - in_dim))).astype(compute_dtype)

    grid = (b_pad // tb,)

    def batch_tiled(cols):
        return pl.BlockSpec((tb, cols), lambda i: (i, 0))

    def replicated(shape):
        return pl.BlockSpec(shape, lambda i: (0, 0))

    in_specs = [
        batch_tiled(d0),                                   # x tile
        replicated(w1p.shape), replicated(b1p.shape),
        replicated(w2p.shape), replicated(b2p.shape),
        replicated(w3p.shape), replicated(b3p.shape),
        replicated(w4p.shape), replicated(b4p.shape),
    ]
    out_specs = batch_tiled(d4)                            # lane-dense scores

    # Cost estimate from REAL (unpadded) sizes.
    r_in, r1, r2, r3, r_out = real_dims
    flops = 2 * B * (r_in * r1 + r1 * r2 + r2 * r3 + r3 * r_out)
    w_itemsize = jnp.dtype(compute_dtype).itemsize
    bytes_accessed = (
        B * r_in * w_itemsize
        + (r_in * r1 + r1 * r2 + r2 * r3 + r3 * r_out) * w_itemsize
        + (r1 + r2 + r3 + r_out) * 4
        + B * out_dim * 4)

    scores = pl.pallas_call(
        _encoder_kernel,
        out_shape=jax.ShapeDtypeStruct((b_pad, d4), jnp.float32),
        grid=grid,
        in_specs=in_specs,
        out_specs=out_specs,
        compiler_params=pltpu.CompilerParams(
            dimension_semantics=("parallel",),
        ),
        cost_estimate=pl.CostEstimate(
            flops=flops, transcendentals=0, bytes_accessed=bytes_accessed),
    )(xp, w1p, b1p, w2p, b2p, w3p, b3p, w4p, b4p)

    # Split outside the kernel (layout plumbing) and drop padding.
    mu = scores[:B, :zdim]
    sigma = scores[:B, zdim:out_dim]
    return mu, sigma


def encoder_forward(x, prepared_params, *, zdim, tb=None):
    """Encoder forward pass. Returns (mu, sigma), each (B, zdim)."""
    arrays, real_dims = prepared_params
    if tb is None:
        _, tb = _choose_tiling(x.shape[0], _num_tensorcores())
    return _encoder_forward_impl(x, arrays, zdim=zdim, tb=int(tb),
                                 real_dims=real_dims)


# --------------------------------------------------------------------------- #
# Init + reference
# --------------------------------------------------------------------------- #
def init_encoder_params(key, zdim):
    """Deterministic synthetic init matching nn.Linear shapes.

    PyTorch stores Linear weights as (out, in); we store the transpose (in, out)
    so the kernel computes y = x @ W + b directly on the MXU. Biases are kept
    2-D (1, out) for clean lane broadcasting.
    """
    dims = [(71, 120), (120, 200), (200, 120), (120, 2 * zdim)]
    params = []
    for (fan_in, fan_out) in dims:
        key, kw, kb = jax.random.split(key, 3)
        bound = 1.0 / jnp.sqrt(fan_in)
        w = jax.random.uniform(kw, (fan_in, fan_out), jnp.float32, -bound, bound)
        b = jax.random.uniform(kb, (1, fan_out), jnp.float32, -bound, bound)
        params += [w, b]
    return tuple(params)


def encoder_reference(x, params, zdim):
    """Pure-JAX f32 reference of the PyTorch forward pass for validation."""
    w1, b1, w2, b2, w3, b3, w4, b4 = params
    h = jnp.maximum(x @ w1 + b1, 0.0)
    h = jnp.maximum(h @ w2 + b2, 0.0)
    h = jnp.maximum(h @ w3 + b3, 0.0)
    scores = h @ w4 + b4
    return scores[:, :zdim], scores[:, zdim:]


if __name__ == "__main__":
    zdim = 16
    batch = 300   # ragged on purpose: pads to 384 rows

    key = jax.random.PRNGKey(0)
    key, kx = jax.random.split(key)
    x = jax.random.normal(kx, (batch, 71), dtype=jnp.float32)
    params = init_encoder_params(key, zdim)
    mu_ref, sigma_ref = encoder_reference(x, params, zdim)

    # Fast path: bf16 matmul inputs, f32 accumulation (default).
    prepared_bf16 = prepare_encoder_params(params)           # pad + cast once
    mu, sigma = encoder_forward(x, prepared_bf16, zdim=zdim)
    jax.block_until_ready((mu, sigma))
    assert mu.shape == (batch, zdim) and sigma.shape == (batch, zdim)
    assert jnp.allclose(mu, mu_ref, atol=5e-2, rtol=5e-2)
    assert jnp.allclose(sigma, sigma_ref, atol=5e-2, rtol=5e-2)

    # Debug path: full f32, exact parity with the reference.
    prepared_f32 = prepare_encoder_params(params, compute_dtype=jnp.float32)
    mu32, sigma32 = encoder_forward(x, prepared_f32, zdim=zdim)
    jax.block_until_ready((mu32, sigma32))
    assert jnp.allclose(mu32, mu_ref, atol=1e-5, rtol=1e-5)
    assert jnp.allclose(sigma32, sigma_ref, atol=1e-5, rtol=1e-5)

    print("KERNEL_OK")
</pallas_src>

<mosaic_0001>
module attributes {stable_mosaic.version = 11 : i64} {
  func.func @_encoder_kernel(%arg0: i32, %arg1: memref<128x128xbf16, #tpu.memory_space<vmem>>, %arg2: memref<128x128xbf16, #tpu.memory_space<vmem>>, %arg3: memref<1x128xf32, #tpu.memory_space<vmem>>, %arg4: memref<128x256xbf16, #tpu.memory_space<vmem>>, %arg5: memref<1x256xf32, #tpu.memory_space<vmem>>, %arg6: memref<256x128xbf16, #tpu.memory_space<vmem>>, %arg7: memref<1x128xf32, #tpu.memory_space<vmem>>, %arg8: memref<128x128xbf16, #tpu.memory_space<vmem>>, %arg9: memref<1x128xf32, #tpu.memory_space<vmem>>, %arg10: memref<128x128xf32, #tpu.memory_space<vmem>>) attributes {dimension_semantics = [#tpu.dimension_semantics<parallel>], iteration_bounds = array<i64: 3>, scalar_prefetch = 0 : i64, scratch_operands = 0 : i64, tpu.core_type = #tpu.core_type<tc>, window_params = [{transform_indices = @transform_0, window_bounds = array<i64: 128, 128>}, {pipeline_mode = #tpu.pipeline_mode<synchronous>, transform_indices = @transform_1, window_bounds = array<i64: 128, 128>}, {pipeline_mode = #tpu.pipeline_mode<synchronous>, transform_indices = @transform_2, window_bounds = array<i64: 1, 128>}, {pipeline_mode = #tpu.pipeline_mode<synchronous>, transform_indices = @transform_3, window_bounds = array<i64: 128, 256>}, {pipeline_mode = #tpu.pipeline_mode<synchronous>, transform_indices = @transform_4, window_bounds = array<i64: 1, 256>}, {pipeline_mode = #tpu.pipeline_mode<synchronous>, transform_indices = @transform_5, window_bounds = array<i64: 256, 128>}, {pipeline_mode = #tpu.pipeline_mode<synchronous>, transform_indices = @transform_6, window_bounds = array<i64: 1, 128>}, {pipeline_mode = #tpu.pipeline_mode<synchronous>, transform_indices = @transform_7, window_bounds = array<i64: 128, 128>}, {pipeline_mode = #tpu.pipeline_mode<synchronous>, transform_indices = @transform_8, window_bounds = array<i64: 1, 128>}, {transform_indices = @transform_9, window_bounds = array<i64: 128, 128>}]} {
    %c0 = arith.constant 0 : index
    %c0_0 = arith.constant 0 : index
    %0 = vector.load %arg1[%c0, %c0_0] : memref<128x128xbf16, #tpu.memory_space<vmem>>, vector<128x128xbf16>
    %c0_1 = arith.constant 0 : index
    %c0_2 = arith.constant 0 : index
    %1 = vector.load %arg2[%c0_1, %c0_2] : memref<128x128xbf16, #tpu.memory_space<vmem>>, vector<128x128xbf16>
    %cst = arith.constant dense<0.000000e+00> : vector<128x128xf32>
    %2 = tpu.matmul %0, %1, %cst {dimension_numbers = #tpu.dot_dimension_numbers<[1], [0], [0], [1], [0, 0, 1, 1], [], []>} : vector<128x128xbf16>, vector<128x128xbf16>, vector<128x128xf32> -> vector<128x128xf32>
    %c0_3 = arith.constant 0 : index
    %c0_4 = arith.constant 0 : index
    %3 = vector.load %arg3[%c0_3, %c0_4] : memref<1x128xf32, #tpu.memory_space<vmem>>, vector<1x128xf32>
    %4 = vector.broadcast %3 : vector<1x128xf32> to vector<128x128xf32>
    %5 = arith.addf %2, %4 : vector<128x128xf32>
    %cst_5 = arith.constant 0.000000e+00 : f32
    %6 = vector.broadcast %cst_5 : f32 to vector<128x128xf32>
    %7 = arith.maximumf %5, %6 : vector<128x128xf32>
    %8 = arith.truncf %7 : vector<128x128xf32> to vector<128x128xbf16>
    %c0_6 = arith.constant 0 : index
    %c0_7 = arith.constant 0 : index
    %9 = vector.load %arg4[%c0_6, %c0_7] : memref<128x256xbf16, #tpu.memory_space<vmem>>, vector<128x256xbf16>
    %cst_8 = arith.constant dense<0.000000e+00> : vector<128x256xf32>
    %10 = tpu.matmul %8, %9, %cst_8 {dimension_numbers = #tpu.dot_dimension_numbers<[1], [0], [0], [1], [0, 0, 1, 1], [], []>} : vector<128x128xbf16>, vector<128x256xbf16>, vector<128x256xf32> -> vector<128x256xf32>
    %c0_9 = arith.constant 0 : index
    %c0_10 = arith.constant 0 : index
    %11 = vector.load %arg5[%c0_9, %c0_10] : memref<1x256xf32, #tpu.memory_space<vmem>>, vector<1x256xf32>
    %12 = vector.broadcast %11 : vector<1x256xf32> to vector<128x256xf32>
    %13 = arith.addf %10, %12 : vector<128x256xf32>
    %cst_11 = arith.constant 0.000000e+00 : f32
    %14 = vector.broadcast %cst_11 : f32 to vector<128x256xf32>
    %15 = arith.maximumf %13, %14 : vector<128x256xf32>
    %16 = arith.truncf %15 : vector<128x256xf32> to vector<128x256xbf16>
    %c0_12 = arith.constant 0 : index
    %c0_13 = arith.constant 0 : index
    %17 = vector.load %arg6[%c0_12, %c0_13] : memref<256x128xbf16, #tpu.memory_space<vmem>>, vector<256x128xbf16>
    %cst_14 = arith.constant dense<0.000000e+00> : vector<128x128xf32>
    %18 = tpu.matmul %16, %17, %cst_14 {dimension_numbers = #tpu.dot_dimension_numbers<[1], [0], [0], [1], [0, 0, 1, 1], [], []>} : vector<128x256xbf16>, vector<256x128xbf16>, vector<128x128xf32> -> vector<128x128xf32>
    %c0_15 = arith.constant 0 : index
    %c0_16 = arith.constant 0 : index
    %19 = vector.load %arg7[%c0_15, %c0_16] : memref<1x128xf32, #tpu.memory_space<vmem>>, vector<1x128xf32>
    %20 = vector.broadcast %19 : vector<1x128xf32> to vector<128x128xf32>
    %21 = arith.addf %18, %20 : vector<128x128xf32>
    %cst_17 = arith.constant 0.000000e+00 : f32
    %22 = vector.broadcast %cst_17 : f32 to vector<128x128xf32>
    %23 = arith.maximumf %21, %22 : vector<128x128xf32>
    %24 = arith.truncf %23 : vector<128x128xf32> to vector<128x128xbf16>
    %c0_18 = arith.constant 0 : index
    %c0_19 = arith.constant 0 : index
    %25 = vector.load %arg8[%c0_18, %c0_19] : memref<128x128xbf16, #tpu.memory_space<vmem>>, vector<128x128xbf16>
    %cst_20 = arith.constant dense<0.000000e+00> : vector<128x128xf32>
    %26 = tpu.matmul %24, %25, %cst_20 {dimension_numbers = #tpu.dot_dimension_numbers<[1], [0], [0], [1], [0, 0, 1, 1], [], []>} : vector<128x128xbf16>, vector<128x128xbf16>, vector<128x128xf32> -> vector<128x128xf32>
    %c0_21 = arith.constant 0 : index
    %c0_22 = arith.constant 0 : index
    %27 = vector.load %arg9[%c0_21, %c0_22] : memref<1x128xf32, #tpu.memory_space<vmem>>, vector<1x128xf32>
    %28 = vector.broadcast %27 : vector<1x128xf32> to vector<128x128xf32>
    %29 = arith.addf %26, %28 : vector<128x128xf32>
    %c0_23 = arith.constant 0 : index
    %c0_24 = arith.constant 0 : index
    %30 = vector.load %arg10[%c0_23, %c0_24] : memref<128x128xf32, #tpu.memory_space<vmem>>, vector<128x128xf32>
    tpu.vector_store %arg10[%c0_23, %c0_24], %29 {strides = array<i32>} : memref<128x128xf32, #tpu.memory_space<vmem>>, vector<128x128xf32>,
    return
  }
  func.func @transform_0(%arg0: i32) -> (i32, i32) {
    %c0_i32 = arith.constant 0 : i32
    %c0_i32_0 = arith.constant 0 : i32
    return %arg0, %c0_i32 : i32, i32
  }
  func.func @transform_1(%arg0: i32) -> (i32, i32) {
    %c0_i32 = arith.constant 0 : i32
    %c0_i32_0 = arith.constant 0 : i32
    %c0_i32_1 = arith.constant 0 : i32
    return %c0_i32, %c0_i32_0 : i32, i32
  }
  func.func @transform_2(%arg0: i32) -> (i32, i32) {
    %c0_i32 = arith.constant 0 : i32
    %c0_i32_0 = arith.constant 0 : i32
    %c0_i32_1 = arith.constant 0 : i32
    return %c0_i32, %c0_i32_0 : i32, i32
  }
  func.func @transform_3(%arg0: i32) -> (i32, i32) {
    %c0_i32 = arith.constant 0 : i32
    %c0_i32_0 = arith.constant 0 : i32
    %c0_i32_1 = arith.constant 0 : i32
    return %c0_i32, %c0_i32_0 : i32, i32
  }
  func.func @transform_4(%arg0: i32) -> (i32, i32) {
    %c0_i32 = arith.constant 0 : i32
    %c0_i32_0 = arith.constant 0 : i32
    %c0_i32_1 = arith.constant 0 : i32
    return %c0_i32, %c0_i32_0 : i32, i32
  }
  func.func @transform_5(%arg0: i32) -> (i32, i32) {
    %c0_i32 = arith.constant 0 : i32
    %c0_i32_0 = arith.constant 0 : i32
    %c0_i32_1 = arith.constant 0 : i32
    return %c0_i32, %c0_i32_0 : i32, i32
  }
  func.func @transform_6(%arg0: i32) -> (i32, i32) {
    %c0_i32 = arith.constant 0 : i32
    %c0_i32_0 = arith.constant 0 : i32
    %c0_i32_1 = arith.constant 0 : i32
    return %c0_i32, %c0_i32_0 : i32, i32
  }
  func.func @transform_7(%arg0: i32) -> (i32, i32) {
    %c0_i32 = arith.constant 0 : i32
    %c0_i32_0 = arith.constant 0 : i32
    %c0_i32_1 = arith.constant 0 : i32
    return %c0_i32, %c0_i32_0 : i32, i32
  }
  func.func @transform_8(%arg0: i32) -> (i32, i32) {
    %c0_i32 = arith.constant 0 : i32
    %c0_i32_0 = arith.constant 0 : i32
    %c0_i32_1 = arith.constant 0 : i32
    return %c0_i32, %c0_i32_0 : i32, i32
  }
  func.func @transform_9(%arg0: i32) -> (i32, i32) {
    %c0_i32 = arith.constant 0 : i32
    %c0_i32_0 = arith.constant 0 : i32
    return %arg0, %c0_i32 : i32, i32
  }
}

</mosaic_0001>

<bundles_post_ra>
// kernel: _encoder_forward_impl.1
= control target key start
LH: loop header
LB: loop body
LE: loop exit
PB: predicated region body
PF: predicated region fallthrough
CT: control target
= control target key end

     0   :  { %s1608_s30 = smov 0   ;;  %s1933_s0 = inlined_call_operand.vmem [shape: bf16[384,128], index: 0, kind: input, shape index: {}]   ;;  %s1934_s1 = inlined_call_operand.vmem [shape: bf16[128,128], index: 1, kind: input, shape index: {}]   ;;  %s1935_s2 = inlined_call_operand.vmem [shape: f32[1,128], index: 2, kind: input, shape index: {}]   ;;  %s1936_s3 = inlined_call_operand.vmem [shape: bf16[128,256], index: 3, kind: input, shape index: {}]   ;;  %s1937_s4 = inlined_call_operand.vmem [shape: f32[1,256], index: 4, kind: input, shape index: {}]   ;;  %s1938_s5 = inlined_call_operand.vmem [shape: bf16[256,128], index: 5, kind: input, shape index: {}]   ;;  %s1939_s6 = inlined_call_operand.vmem [shape: f32[1,128], index: 6, kind: input, shape index: {}]   ;;  %s1940_s7 = inlined_call_operand.vmem [shape: bf16[128,128], index: 7, kind: input, shape index: {}]   ;;  %s1941_s8 = inlined_call_operand.vmem [shape: f32[1,128], index: 8, kind: input, shape index: {}]   ;;  %s1942_s9 = inlined_call_operand.vmem [shape: f32[384,128], index: 9, kind: output, shape index: {}]  }
   0x1 LB: > { %s1232_s10 = sadd.s32 4294967295, %s1556_s30   ;;  %p1236_p0 = scmp.ge.s32.totalorder %s1556_s30, 1  ;;  %s1556_s30 = sphi %s1608_s30, %s19_s30  }
   0x2   : > { %p288_p1 = scmp.lt.s32.totalorder %s1556_s30, 4 }
   0x4   : > { %p289_p2 = pnand %p1236_p0, %p288_p1 }
   0x5   : > { %s1237_s19 = sshll.u32 (!%p289_p2), %s1232_s10, 4 }
   0x6   : > { %292 = sbr.rel (%p289_p2) target bundleno = 720 (0x2d0), region = 56  ;;  %p325_p3 = scmp.lt.s32.totalorder (!%p289_p2), %s1237_s19, 47 }
   0xb   : > { %v1482_v0 = vld [vmem:[%s1934_s1 + $0x38] sm:$0xff]  ;;  %v1481_v1 = vld [vmem:[%s1934_s1 + $0x30] sm:$0xff]  ;;  %v1480_v2 = vld [vmem:[%s1934_s1 + $0x28] sm:$0xff]  ;;  %s1944_s19 = smov (!%p325_p3, %s1237_s19), 47 }
   0xc   : > { %468 = vmatpush.bf16.msra.mxu0 %v1482_v0  ;;  %1523 = vmatpush.bf16.msra.mxu2 %v1482_v0  ;;  %v1479_v3 = vld [vmem:[%s1934_s1 + $0x20] sm:$0xff]  ;;  %v1478_v4 = vld [vmem:[%s1934_s1 + $0x18] sm:$0xff]  ;;  %v1477_v5 = vld [vmem:[%s1934_s1 + $0x10] sm:$0xff]  ;;  %s1238_s26 = sshll.u32 %s1944_s19, 2  ;;  %s1240_s18 = sshll.u32 %s1944_s19, 3 }
   0xd   : > { %v1476_v6 = vld [vmem:[%s1934_s1 + $0x8] sm:$0xff]  ;;  %v1475_v7 = vld [vmem:[%s1934_s1] sm:$0xff]  ;;  %s1646_s11 = scalar_lea.vmem %s1933_s0, %s1238_s26  ;;  %v1497_v12 = vld [vmem:[%s1936_s3 + $0x74] sm:$0xf]  ;;  %s1912_s24 = scalar_lea.vmem %s1942_s9, %s1240_s18 }
   0xe   : > { %v1467_v8 = vld [vmem:[%s1646_s11] sm:$0xff]  ;;  %v1468_v10 = vld [vmem:[%s1646_s11 + $0x8] sm:$0xff]  ;;  %v1365_v13 = vld [vmem:[%s1936_s3 + $0x78] sm:$0xf0] }
   0xf   : > { %v1471_v9 = vld [vmem:[%s1646_s11 + $0x20] sm:$0xff]  ;;  %v1472_v11 = vld [vmem:[%s1646_s11 + $0x28] sm:$0xff]  ;;  %v1368_v14 = vor.u32 %v1497_v12, %v1365_v13  ;;  %v1493_v18 = vld [vmem:[%s1936_s3 + $0x54] sm:$0xf] }
  0x10   : > { %469 = vmatpush.bf16.msra.mxu0 %v1481_v1  ;;  %1524 = vmatpush.bf16.msra.mxu2 %v1481_v1  ;;  %v1495_v15 = vld [vmem:[%s1936_s3 + $0x64] sm:$0xf]  ;;  %v1357_v16 = vld [vmem:[%s1936_s3 + $0x68] sm:$0xf0]  ;;  %v1363_v19 = vld [vmem:[%s1936_s3 + $0x70] sm:$0xf] }
  0x11   : > { %v1360_v17 = vor.u32 %v1495_v15, %v1357_v16  ;;  %v1498_v20 = vld [vmem:[%s1936_s3 + $0x74] sm:$0xf0]  ;;  %v1349_v21 = vld [vmem:[%s1936_s3 + $0x58] sm:$0xf0]  ;;  %v1355_v23 = vld [vmem:[%s1936_s3 + $0x60] sm:$0xf] }
  0x12   : > { %v1364_v22 = vor.u32 %v1498_v20, %v1363_v19  ;;  %v1496_v24 = vld [vmem:[%s1936_s3 + $0x64] sm:$0xf0]  ;;  %v1352_v26 = vor.u32 %v1493_v18, %v1349_v21  ;;  %v1347_v27 = vld [vmem:[%s1936_s3 + $0x50] sm:$0xf]  ;;  %v1494_v28 = vld [vmem:[%s1936_s3 + $0x54] sm:$0xf0] }
  0x13   : > { %v1356_v25 = vor.u32 %v1496_v24, %v1355_v23  ;;  %v1491_v29 = vld [vmem:[%s1936_s3 + $0x44] sm:$0xf]  ;;  %v1341_v30 = vld [vmem:[%s1936_s3 + $0x48] sm:$0xf0]  ;;  %v1348_v31 = vor.u32 %v1494_v28, %v1347_v27  ;;  %v1469_v32 = vld [vmem:[%s1646_s11 + $0x10] sm:$0xff] }
  0x14   : > { %470 = vmatpush.bf16.msra.mxu0 %v1480_v2  ;;  %1525 = vmatpush.bf16.msra.mxu2 %v1480_v2  ;;  %v1344_v33 = vor.u32 %v1491_v29, %v1341_v30  ;;  %v1339_v34 = vld [vmem:[%s1936_s3 + $0x40] sm:$0xf]  ;;  %v1492_v35 = vld [vmem:[%s1936_s3 + $0x44] sm:$0xf0]  ;;  %v1489_v36 = vld [vmem:[%s1936_s3 + $0x34] sm:$0xf] }
  0x15   : > { %643 = vmatpush.bf16.msra.mxu1 %v1364_v22  ;;  %1531 = vmatpush.bf16.msra.mxu3 %v1364_v22  ;;  %v1333_v37 = vld [vmem:[%s1936_s3 + $0x38] sm:$0xf0]  ;;  %v1473_v38 = vld [vmem:[%s1646_s11 + $0x30] sm:$0xff]  ;;  %v1340_v39 = vor.u32 %v1492_v35, %v1339_v34  ;;  %v1487_v41 = vld [vmem:[%s1936_s3 + $0x24] sm:$0xf] }
  0x16   : > { %v1336_v40 = vor.u32 %v1489_v36, %v1333_v37  ;;  %v1325_v42 = vld [vmem:[%s1936_s3 + $0x28] sm:$0xf0]  ;;  %v1470_v44 = vld [vmem:[%s1646_s11 + $0x18] sm:$0xff]  ;;  %v1331_v46 = vld [vmem:[%s1936_s3 + $0x30] sm:$0xf] }
  0x17   : > { %v1328_v43 = vor.u32 %v1487_v41, %v1325_v42  ;;  %v1474_v45 = vld [vmem:[%s1646_s11 + $0x38] sm:$0xff]  ;;  %v1323_v49 = vld [vmem:[%s1936_s3 + $0x20] sm:$0xf]  ;;  %v1488_v50 = vld [vmem:[%s1936_s3 + $0x24] sm:$0xf0] }
  0x18   : > { %471 = vmatpush.bf16.msra.mxu0 %v1479_v3  ;;  %1526 = vmatpush.bf16.msra.mxu2 %v1479_v3  ;;  %v1490_v47 = vld [vmem:[%s1936_s3 + $0x34] sm:$0xf0]  ;;  %v1324_v51 = vor.u32 %v1488_v50, %v1323_v49  ;;  %v1485_v52 = vld [vmem:[%s1936_s3 + $0x14] sm:$0xf]  ;;  %v1317_v53 = vld [vmem:[%s1936_s3 + $0x18] sm:$0xf0] }
  0x19   : > { %644 = vmatpush.bf16.msra.mxu1 %v1356_v25  ;;  %1532 = vmatpush.bf16.msra.mxu3 %v1356_v25  ;;  %v1332_v48 = vor.u32 %v1490_v47, %v1331_v46  ;;  %v1320_v54 = vor.u32 %v1485_v52, %v1317_v53  ;;  %v1315_v55 = vld [vmem:[%s1936_s3 + $0x10] sm:$0xf]  ;;  %v1486_v56 = vld [vmem:[%s1936_s3 + $0x14] sm:$0xf0]  ;;  %v1483_v58 = vld [vmem:[%s1936_s3 + $0x4] sm:$0xf] }
  0x1a   : > { %v1316_v57 = vor.u32 %v1486_v56, %v1315_v55  ;;  %v1309_v59 = vld [vmem:[%s1936_s3 + $0x8] sm:$0xf0]  ;;  %v1307_v60 = vld [vmem:[%s1936_s3] sm:$0xf]  ;;  %v1484_v62 = vld [vmem:[%s1936_s3 + $0x4] sm:$0xf0] }
  0x1b   : > { %v1312_v61 = vor.u32 %v1483_v58, %v1309_v59  ;;  %v1308_v63 = vor.u32 %v1484_v62, %v1307_v60  ;;  %v1755_v1 = vld [vmem:[%s1935_s2] ss:$0 sm:$0xff]  ;;  %v1505_v53 = vld [vmem:[%s1938_s5 + $0x30] sm:$0xff]  ;;  %v1504_v55 = vld [vmem:[%s1938_s5 + $0x28] sm:$0xff] }
  0x1c   : > { %472 = vmatpush.bf16.msra.mxu0 %v1478_v4  ;;  %1527 = vmatpush.bf16.msra.mxu2 %v1478_v4  ;;  %v1513_v56 = vld [vmem:[%s1938_s5 + $0x70] sm:$0xff]  ;;  %v1503_v62 = vld [vmem:[%s1938_s5 + $0x20] sm:$0xff] }
  0x1d   : > { %645 = vmatpush.bf16.msra.mxu1 %v1348_v31  ;;  %1533 = vmatpush.bf16.msra.mxu3 %v1348_v31 }
  0x20   : > { %473 = vmatpush.bf16.msra.mxu0 %v1477_v5  ;;  %1528 = vmatpush.bf16.msra.mxu2 %v1477_v5 }
  0x21   : > { %646 = vmatpush.bf16.msra.mxu1 %v1340_v39  ;;  %1534 = vmatpush.bf16.msra.mxu3 %v1340_v39 }
  0x24   : > { %474 = vmatpush.bf16.msra.mxu0 %v1476_v6  ;;  %1529 = vmatpush.bf16.msra.mxu2 %v1476_v6 }
  0x25   : > { %647 = vmatpush.bf16.msra.mxu1 %v1332_v48  ;;  %1535 = vmatpush.bf16.msra.mxu3 %v1332_v48 }
  0x28   : > { %475 = vmatpush.bf16.msra.mxu0 %v1475_v7  ;;  %1530 = vmatpush.bf16.msra.mxu2 %v1475_v7 }
  0x29   : > { %648 = vmatpush.bf16.msra.mxu1 %v1324_v51  ;;  %1536 = vmatpush.bf16.msra.mxu3 %v1324_v51 }
  0x2b   : > { %476 = vmatmul.bf16.vlgmr.msra.gmra.mxu0 %v1467_v8  ;;  %496 = vmatmul.bf16.vlgmr.msra.gmra.mxu2 %v1471_v9 }
  0x2c   : > { %692 = vmatpush.bf16.msrb.mxu2 %v1368_v14 }
  0x2d   : > { %649 = vmatpush.bf16.msra.mxu1 %v1316_v57  ;;  %1537 = vmatpush.bf16.msra.mxu3 %v1316_v57 }
  0x30   : > { %693 = vmatpush.bf16.msrb.mxu2 %v1360_v17 }
  0x31   : > { %650 = vmatpush.bf16.msra.mxu1 %v1308_v63  ;;  %1538 = vmatpush.bf16.msra.mxu3 %v1308_v63  ;;  %v1512_v63 = vld [vmem:[%s1938_s5 + $0x68] sm:$0xff] }
  0x34   : > { %694 = vmatpush.bf16.msrb.mxu2 %v1352_v26 }
  0x38   : > { %695 = vmatpush.bf16.msrb.mxu2 %v1344_v33 }
  0x3b   : > { %481 = vmatmul.bf16.gmra.mxu0 %v1468_v10  ;;  %501 = vmatmul.bf16.gmra.mxu2 %v1472_v11 }
  0x3c   : > { %696 = vmatpush.bf16.msrb.mxu2 %v1336_v40 }
  0x40   : > { %697 = vmatpush.bf16.msrb.mxu2 %v1328_v43 }
  0x44   : > { %698 = vmatpush.bf16.msrb.mxu2 %v1320_v54  ;;  %v1514_v54 = vld [vmem:[%s1938_s5 + $0x78] sm:$0xff] }
  0x45   : > { %970 = vmatpush.bf16.msrb.mxu0 %v1514_v54 }
  0x48   : > { %699 = vmatpush.bf16.msrb.mxu2 %v1312_v61 }
  0x49   : > { %971 = vmatpush.bf16.msrb.mxu0 %v1513_v56 }
  0x4b   : > { %486 = vmatmul.bf16.gmra.mxu0 %v1469_v32  ;;  %506 = vmatmul.bf16.gmra.mxu2 %v1473_v38  ;;  %v1506_v38 = vld [vmem:[%s1938_s5 + $0x38] sm:$0xff] }
  0x4c   : > { %921 = vmatpush.bf16.msrb.mxu3 %v1506_v38 }
  0x4d   : > { %972 = vmatpush.bf16.msrb.mxu0 %v1512_v63 }
  0x50   : > { %922 = vmatpush.bf16.msrb.mxu3 %v1505_v53 }
  0x54   : > { %923 = vmatpush.bf16.msrb.mxu3 %v1504_v55 }
  0x58   : > { %924 = vmatpush.bf16.msrb.mxu3 %v1503_v62 }
  0x5b   : > { %491 = vmatmul.bf16.gmra.mxu0 %v1470_v44  ;;  %511 = vmatmul.bf16.gmra.mxu2 %v1474_v45 }
  0xa8   : > { %v477_v0 = vpop.f32.mrf.mxu0 }
  0xa9   : > { %v478_v2 = vadd.f32 %v1755_v1, %v477_v0  ;;  %v1502_v0 = vld [vmem:[%s1938_s5 + $0x18] sm:$0xff] }
  0xaa   : > { %925 = vmatpush.bf16.msrb.mxu3 %v1502_v0 }
  0xab   : > { %v517_v6 = vmax.f32 %v478_v2, 0.0  ;;  %v1501_v2 = vld [vmem:[%s1938_s5 + $0x10] sm:$0xff] }
  0xae   : > { %v497_v5 = vpop.f32.mrf.mxu2  ;;  %926 = vmatpush.bf16.msrb.mxu3 %v1501_v2 }
  0xaf   : > { %v498_v9 = vadd.f32 %v1755_v1, %v497_v5  ;;  %v1509_v5 = vld [vmem:[%s1938_s5 + $0x50] sm:$0xff] }
  0xb0   : > { %v479_v3 = vpop.f32.mrf.mxu0 }
  0xb1   : > { %v480_v4 = vadd.f32 %v1755_v1, %v479_v3  ;;  %v525_v12 = vmax.f32 %v498_v9, 0.0  ;;  %v1510_v3 = vld [vmem:[%s1938_s5 + $0x58] sm:$0xff]  ;;  %v557_v9 = vld [vmem:[%s1937_s4] sm:$0x3] }
  0xb3   : > { %v518_v7 = vmax.f32 %v480_v4, 0.0  ;;  %v1500_v4 = vld [vmem:[%s1938_s5 + $0x8] sm:$0xff] }
  0xb4   : > { %927 = vmatpush.bf16.msrb.mxu3 %v1500_v4 }
  0xb5   : > { %v533_v8 = vpack.c.bf16 %v518_v7, %v517_v6  ;;  %v1499_v6 = vld [vmem:[%s1938_s5] sm:$0xff]  ;;  %v1508_v7 = vld [vmem:[%s1938_s5 + $0x48] sm:$0xff] }
  0xb6   : > { %v499_v11 = vpop.f32.mrf.mxu2 }
  0xb7   : > { %651 = vmatmul.bf16.vlgmr.msra.gmra.mxu1 %v533_v8  ;;  %700 = vmatmul.bf16.vlgmr.msrb.gmra.mxu2 %v533_v8  ;;  %v500_v13 = vadd.f32 %v1755_v1, %v499_v11  ;;  %v1507_v8 = vld [vmem:[%s1938_s5 + $0x40] sm:$0xff]  ;;  %v1824_v11 = vperm.slane %v557_v9, 0 }
  0xb8   : > { %v482_v10 = vpop.f32.mrf.mxu0  ;;  %928 = vmatpush.bf16.msrb.mxu3 %v1499_v6  ;;  %v1522_v6 = vld [vmem:[%s1940_s7 + $0x38] sm:$0xff] }
  0xb9   : > { %v526_v14 = vmax.f32 %v500_v13, 0.0  ;;  %v483_v15 = vadd.f32 %v1755_v1, %v482_v10  ;;  %1111 = vmatpush.bf16.msrb.mxu1 %v1522_v6 }
  0xbb   : > { %v537_v16 = vpack.c.bf16 %v526_v14, %v525_v12  ;;  %v519_v20 = vmax.f32 %v483_v15, 0.0  ;;  %v1827_v15 = vperm.slane %v557_v9, 1 }
  0xbd   : > { %671 = vmatmul.bf16.vlgmr.msra.gmra.mxu3 %v537_v16 }
  0xbe   : > { %v502_v19 = vpop.f32.mrf.mxu2 }
  0xbf   : > { %v503_v23 = vadd.f32 %v1755_v1, %v502_v19 }
  0xc0   : > { %v484_v17 = vpop.f32.mrf.mxu0 }
  0xc1   : > { %v485_v18 = vadd.f32 %v1755_v1, %v484_v17  ;;  %v527_v26 = vmax.f32 %v503_v23, 0.0 }
  0xc3   : > { %v520_v21 = vmax.f32 %v485_v18, 0.0 }
  0xc5   : > { %v534_v22 = vpack.c.bf16 %v520_v21, %v519_v20 }
  0xc6   : > { %v504_v25 = vpop.f32.mrf.mxu2 }
  0xc7   : > { %656 = vmatmul.bf16.gmra.mxu1 %v534_v22  ;;  %705 = vmatmul.bf16.gmra.mxu2 %v534_v22  ;;  %v505_v27 = vadd.f32 %v1755_v1, %v504_v25 }
  0xc8   : > { %v487_v24 = vpop.f32.mrf.mxu0 }
  0xc9   : > { %v528_v28 = vmax.f32 %v505_v27, 0.0  ;;  %v488_v29 = vadd.f32 %v1755_v1, %v487_v24 }
  0xcb   : > { %v538_v30 = vpack.c.bf16 %v528_v28, %v527_v26  ;;  %v521_v34 = vmax.f32 %v488_v29, 0.0 }
  0xcd   : > { %676 = vmatmul.bf16.gmra.mxu3 %v538_v30 }
  0xce   : > { %v507_v33 = vpop.f32.mrf.mxu2 }
  0xcf   : > { %v508_v37 = vadd.f32 %v1755_v1, %v507_v33 }
  0xd0   : > { %v489_v31 = vpop.f32.mrf.mxu0 }
  0xd1   : > { %v490_v32 = vadd.f32 %v1755_v1, %v489_v31  ;;  %v529_v41 = vmax.f32 %v508_v37, 0.0 }
  0xd3   : > { %v522_v35 = vmax.f32 %v490_v32, 0.0 }
  0xd5   : > { %v535_v36 = vpack.c.bf16 %v522_v35, %v521_v34 }
  0xd6   : > { %v509_v40 = vpop.f32.mrf.mxu2 }
  0xd7   : > { %661 = vmatmul.bf16.gmra.mxu1 %v535_v36  ;;  %710 = vmatmul.bf16.gmra.mxu2 %v535_v36  ;;  %v510_v42 = vadd.f32 %v1755_v1, %v509_v40 }
  0xd8   : > { %v492_v39 = vpop.f32.mrf.mxu0 }
  0xd9   : > { %v530_v43 = vmax.f32 %v510_v42, 0.0  ;;  %v493_v44 = vadd.f32 %v1755_v1, %v492_v39 }
  0xdb   : > { %v539_v45 = vpack.c.bf16 %v530_v43, %v529_v41  ;;  %v523_v49 = vmax.f32 %v493_v44, 0.0 }
  0xdd   : > { %681 = vmatmul.bf16.gmra.mxu3 %v539_v45 }
  0xde   : > { %v512_v48 = vpop.f32.mrf.mxu2 }
  0xdf   : > { %v513_v52 = vadd.f32 %v1755_v1, %v512_v48 }
  0xe0   : > { %v494_v46 = vpop.f32.mrf.mxu0 }
  0xe1   : > { %v495_v47 = vadd.f32 %v1755_v1, %v494_v46  ;;  %v531_v58 = vmax.f32 %v513_v52, 0.0 }
  0xe3   : > { %v524_v50 = vmax.f32 %v495_v47, 0.0 }
  0xe5   : > { %v536_v51 = vpack.c.bf16 %v524_v50, %v523_v49 }
  0xe6   : > { %v514_v57 = vpop.f32.mrf.mxu2 }
  0xe7   : > { %666 = vmatmul.bf16.gmra.mxu1 %v536_v51  ;;  %715 = vmatmul.bf16.gmra.mxu2 %v536_v51  ;;  %v515_v59 = vadd.f32 %v1755_v1, %v514_v57  ;;  %v1511_v1 = vld [vmem:[%s1938_s5 + $0x60] sm:$0xff] }
  0xe8   : > { %973 = vmatpush.bf16.msrb.mxu0 %v1511_v1 }
  0xe9   : > { %v532_v60 = vmax.f32 %v515_v59, 0.0 }
  0xeb   : > { %v540_v61 = vpack.c.bf16 %v532_v60, %v531_v58 }
  0xec   : > { %974 = vmatpush.bf16.msrb.mxu0 %v1510_v3 }
  0xed   : > { %686 = vmatmul.bf16.gmra.mxu3 %v540_v61 }
  0xf0   : > { %975 = vmatpush.bf16.msrb.mxu0 %v1509_v5 }
  0xf4   : > { %976 = vmatpush.bf16.msrb.mxu0 %v1508_v7 }
  0xf7   : > { %720 = vmatmul.bf16.gmra.mxu2 %v537_v16 }
  0xf8   : > { %977 = vmatpush.bf16.msrb.mxu0 %v1507_v8 }
 0x107   : > { %725 = vmatmul.bf16.gmra.mxu2 %v538_v30 }
 0x117   : > { %730 = vmatmul.bf16.gmra.mxu2 %v539_v45 }
 0x127   : > { %735 = vmatmul.bf16.gmra.mxu2 %v540_v61 }
 0x134   : > { %v652_v10 = vpop.f32.mrf.mxu1 }
 0x135   : > { %v653_v13 = vadd.f32 %v652_v10, %v1824_v11 }
 0x137   : > { %v741_v17 = vmax.f32 %v653_v13, 0.0 }
 0x13a   : > { %v701_v12 = vpop.f32.mrf.mxu2 }
 0x13b   : > { %v702_v19 = vadd.f32 %v701_v12, %v1827_v15 }
 0x13c   : > { %v654_v14 = vpop.f32.mrf.mxu1 }
 0x13d   : > { %v655_v16 = vadd.f32 %v654_v14, %v1824_v11  ;;  %v742_v24 = vmax.f32 %v702_v19, 0.0  ;;  %v1521_v14 = vld [vmem:[%s1940_s7 + $0x30] sm:$0xff] }
 0x13e   : > { %1112 = vmatpush.bf16.msrb.mxu1 %v1521_v14 }
 0x13f   : > { %v743_v18 = vmax.f32 %v655_v16, 0.0 }
 0x140   : > { %v672_v47 = vpop.f32.mrf.mxu3 }
 0x141   : > { %v773_v20 = vpack.c.bf16 %v743_v18, %v741_v17  ;;  %v673_v8 = vadd.f32 %v672_v47, %v1824_v11 }
 0x142   : > { %v703_v21 = vpop.f32.mrf.mxu2 }
 0x143   : > { %v704_v22 = vadd.f32 %v703_v21, %v1827_v15  ;;  %929 = vmatmul.bf16.vlgmr.msrb.gmra.mxu3 %v773_v20  ;;  %v757_v12 = vmax.f32 %v673_v8, 0.0 }
 0x144   : > { %v657_v23 = vpop.f32.mrf.mxu1 }
 0x145   : > { %v744_v25 = vmax.f32 %v704_v22, 0.0  ;;  %v658_v28 = vadd.f32 %v657_v23, %v1824_v11  ;;  %v1520_v23 = vld [vmem:[%s1940_s7 + $0x28] sm:$0xff] }
 0x146   : > { %1113 = vmatpush.bf16.msrb.mxu1 %v1520_v23 }
 0x147   : > { %v774_v26 = vpack.c.bf16 %v744_v25, %v742_v24  ;;  %v745_v31 = vmax.f32 %v658_v28, 0.0 }
 0x148   : > { %v674_v57 = vpop.f32.mrf.mxu3 }
 0x149   : > { %978 = vmatmul.bf16.vlgmr.msrb.gmra.mxu0 %v774_v26  ;;  %v675_v9 = vadd.f32 %v674_v57, %v1824_v11 }
 0x14a   : > { %v706_v27 = vpop.f32.mrf.mxu2 }
 0x14b   : > { %v707_v33 = vadd.f32 %v706_v27, %v1827_v15  ;;  %v759_v13 = vmax.f32 %v675_v9, 0.0 }
 0x14c   : > { %v659_v29 = vpop.f32.mrf.mxu1 }
 0x14d   : > { %v660_v30 = vadd.f32 %v659_v29, %v1824_v11  ;;  %v746_v38 = vmax.f32 %v707_v33, 0.0  ;;  %v781_v18 = vpack.c.bf16 %v759_v13, %v757_v12 }
 0x14f   : > { %v747_v32 = vmax.f32 %v660_v30, 0.0 }
 0x150   : > { %v677_v3 = vpop.f32.mrf.mxu3 }
 0x151   : > { %v775_v34 = vpack.c.bf16 %v747_v32, %v745_v31  ;;  %v678_v26 = vadd.f32 %v677_v3, %v1824_v11  ;;  %v1519_v31 = vld [vmem:[%s1940_s7 + $0x20] sm:$0xff] }
 0x152   : > { %v708_v35 = vpop.f32.mrf.mxu2  ;;  %1114 = vmatpush.bf16.msrb.mxu1 %v1519_v31 }
 0x153   : > { %v709_v36 = vadd.f32 %v708_v35, %v1827_v15  ;;  %934 = vmatmul.bf16.gmra.mxu3 %v775_v34  ;;  %v761_v29 = vmax.f32 %v678_v26, 0.0 }
 0x154   : > { %v662_v37 = vpop.f32.mrf.mxu1 }
 0x155   : > { %v748_v39 = vmax.f32 %v709_v36, 0.0  ;;  %v663_v42 = vadd.f32 %v662_v37, %v1824_v11 }
 0x157   : > { %v776_v40 = vpack.c.bf16 %v748_v39, %v746_v38  ;;  %v749_v45 = vmax.f32 %v663_v42, 0.0  ;;  %v1518_v39 = vld [vmem:[%s1940_s7 + $0x18] sm:$0xff] }
 0x158   : > { %v679_v16 = vpop.f32.mrf.mxu3  ;;  %1115 = vmatpush.bf16.msrb.mxu1 %v1518_v39 }
 0x159   : > { %983 = vmatmul.bf16.gmra.mxu0 %v776_v40  ;;  %v680_v27 = vadd.f32 %v679_v16, %v1824_v11 }
 0x15a   : > { %v711_v41 = vpop.f32.mrf.mxu2 }
 0x15b   : > { %v712_v48 = vadd.f32 %v711_v41, %v1827_v15  ;;  %v763_v30 = vmax.f32 %v680_v27, 0.0 }
 0x15c   : > { %v664_v43 = vpop.f32.mrf.mxu1 }
 0x15d   : > { %v665_v44 = vadd.f32 %v664_v43, %v1824_v11  ;;  %v750_v53 = vmax.f32 %v712_v48, 0.0  ;;  %v783_v33 = vpack.c.bf16 %v763_v30, %v761_v29  ;;  %v1517_v43 = vld [vmem:[%s1940_s7 + $0x10] sm:$0xff] }
 0x15e   : > { %1116 = vmatpush.bf16.msrb.mxu1 %v1517_v43 }
 0x15f   : > { %v751_v46 = vmax.f32 %v665_v44, 0.0 }
 0x160   : > { %v682_v25 = vpop.f32.mrf.mxu3 }
 0x161   : > { %v777_v49 = vpack.c.bf16 %v751_v46, %v749_v45  ;;  %v683_v41 = vadd.f32 %v682_v25, %v1824_v11 }
 0x162   : > { %v713_v50 = vpop.f32.mrf.mxu2 }
 0x163   : > { %v714_v51 = vadd.f32 %v713_v50, %v1827_v15  ;;  %939 = vmatmul.bf16.gmra.mxu3 %v777_v49  ;;  %v765_v46 = vmax.f32 %v683_v41, 0.0 }
 0x164   : > { %v667_v52 = vpop.f32.mrf.mxu1 }
 0x165   : > { %v752_v54 = vmax.f32 %v714_v51, 0.0  ;;  %v668_v58 = vadd.f32 %v667_v52, %v1824_v11 }
 0x167   : > { %v778_v55 = vpack.c.bf16 %v752_v54, %v750_v53  ;;  %v753_v61 = vmax.f32 %v668_v58, 0.0 }
 0x168   : > { %v684_v34 = vpop.f32.mrf.mxu3 }
 0x169   : > { %988 = vmatmul.bf16.gmra.mxu0 %v778_v55  ;;  %v685_v42 = vadd.f32 %v684_v34, %v1824_v11 }
 0x16a   : > { %v716_v56 = vpop.f32.mrf.mxu2 }
 0x16b   : > { %v717_v63 = vadd.f32 %v716_v56, %v1827_v15  ;;  %v767_v47 = vmax.f32 %v685_v42, 0.0 }
 0x16c   : > { %v669_v59 = vpop.f32.mrf.mxu1 }
 0x16d   : > { %v670_v60 = vadd.f32 %v669_v59, %v1824_v11  ;;  %v754_v4 = vmax.f32 %v717_v63, 0.0  ;;  %v785_v49 = vpack.c.bf16 %v767_v47, %v765_v46  ;;  %v1516_v59 = vld [vmem:[%s1940_s7 + $0x8] sm:$0xff] }
 0x16e   : > { %1117 = vmatpush.bf16.msrb.mxu1 %v1516_v59 }
 0x16f   : > { %v755_v62 = vmax.f32 %v670_v60, 0.0 }
 0x170   : > { %v687_v45 = vpop.f32.mrf.mxu3 }
 0x171   : > { %v779_v0 = vpack.c.bf16 %v755_v62, %v753_v61  ;;  %v688_v56 = vadd.f32 %v687_v45, %v1824_v11 }
 0x172   : > { %v718_v1 = vpop.f32.mrf.mxu2 }
 0x173   : > { %v719_v2 = vadd.f32 %v718_v1, %v1827_v15  ;;  %944 = vmatmul.bf16.gmra.mxu3 %v779_v0  ;;  %v769_v60 = vmax.f32 %v688_v56, 0.0  ;;  %v1515_v1 = vld [vmem:[%s1940_s7] sm:$0xff] }
 0x174   : > { %1118 = vmatpush.bf16.msrb.mxu1 %v1515_v1 }
 0x175   : > { %v756_v5 = vmax.f32 %v719_v2, 0.0 }
 0x177   : > { %v780_v7 = vpack.c.bf16 %v756_v5, %v754_v4 }
 0x178   : > { %v689_v54 = vpop.f32.mrf.mxu3 }
 0x179   : > { %993 = vmatmul.bf16.gmra.mxu0 %v780_v7  ;;  %v690_v57 = vadd.f32 %v689_v54, %v1824_v11  ;;  %v1887_v7 = vld [vmem:[%s1939_s6] ss:$0 sm:$0xff] }
 0x17a   : > { %v721_v10 = vpop.f32.mrf.mxu2 }
 0x17b   : > { %v722_v17 = vadd.f32 %v721_v10, %v1827_v15  ;;  %v771_v61 = vmax.f32 %v690_v57, 0.0 }
 0x17d   : > { %v758_v21 = vmax.f32 %v722_v17, 0.0  ;;  %v787_v63 = vpack.c.bf16 %v771_v61, %v769_v60 }
 0x182   : > { %v723_v19 = vpop.f32.mrf.mxu2 }
 0x183   : > { %v724_v20 = vadd.f32 %v723_v19, %v1827_v15  ;;  %949 = vmatmul.bf16.gmra.mxu3 %v781_v18 }
 0x185   : > { %v760_v22 = vmax.f32 %v724_v20, 0.0 }
 0x187   : > { %v782_v24 = vpack.c.bf16 %v760_v22, %v758_v21 }
 0x189   : > { %998 = vmatmul.bf16.gmra.mxu0 %v782_v24 }
 0x18a   : > { %v726_v28 = vpop.f32.mrf.mxu2 }
 0x18b   : > { %v727_v32 = vadd.f32 %v726_v28, %v1827_v15 }
 0x18d   : > { %v762_v37 = vmax.f32 %v727_v32, 0.0 }
 0x192   : > { %v728_v35 = vpop.f32.mrf.mxu2 }
 0x193   : > { %v729_v36 = vadd.f32 %v728_v35, %v1827_v15  ;;  %954 = vmatmul.bf16.gmra.mxu3 %v783_v33 }
 0x195   : > { %v764_v38 = vmax.f32 %v729_v36, 0.0 }
 0x197   : > { %v784_v40 = vpack.c.bf16 %v764_v38, %v762_v37 }
 0x199   : > { %1003 = vmatmul.bf16.gmra.mxu0 %v784_v40 }
 0x19a   : > { %v731_v44 = vpop.f32.mrf.mxu2 }
 0x19b   : > { %v732_v48 = vadd.f32 %v731_v44, %v1827_v15 }
 0x19d   : > { %v766_v52 = vmax.f32 %v732_v48, 0.0 }
 0x1a2   : > { %v733_v50 = vpop.f32.mrf.mxu2 }
 0x1a3   : > { %v734_v51 = vadd.f32 %v733_v50, %v1827_v15  ;;  %959 = vmatmul.bf16.gmra.mxu3 %v785_v49 }
 0x1a5   : > { %v768_v53 = vmax.f32 %v734_v51, 0.0 }
 0x1a7   : > { %v786_v55 = vpack.c.bf16 %v768_v53, %v766_v52 }
 0x1a9   : > { %1008 = vmatmul.bf16.gmra.mxu0 %v786_v55 }
 0x1aa   : > { %v736_v58 = vpop.f32.mrf.mxu2 }
 0x1ab   : > { %v737_v62 = vadd.f32 %v736_v58, %v1827_v15 }
 0x1ad   : > { %v770_v11 = vmax.f32 %v737_v62, 0.0 }
 0x1b2   : > { %v738_v0 = vpop.f32.mrf.mxu2 }
 0x1b3   : > { %v739_v2 = vadd.f32 %v738_v0, %v1827_v15  ;;  %964 = vmatmul.bf16.gmra.mxu3 %v787_v63 }
 0x1b5   : > { %v772_v3 = vmax.f32 %v739_v2, 0.0 }
 0x1b7   : > { %v788_v4 = vpack.c.bf16 %v772_v3, %v770_v11 }
 0x1b9   : > { %1013 = vmatmul.bf16.gmra.mxu0 %v788_v4 }
 0x1c6   : > { %v930_v5 = vpop.f32.mrf.mxu3  ;;  %v979_v6 = vpop.f32.mrf.mxu0 }
 0x1c7   : > { %v931_v8 = vadd.f32 %v1887_v7, %v930_v5 }
 0x1c9   : > { %v980_v12 = vadd.f32 %v979_v6, %v931_v8 }
 0x1cb   : > { %v1019_v14 = vmax.f32 %v980_v12, 0.0 }
 0x1ce   : > { %v932_v9 = vpop.f32.mrf.mxu3  ;;  %v981_v10 = vpop.f32.mrf.mxu0 }
 0x1cf   : > { %v933_v15 = vadd.f32 %v1887_v7, %v932_v9 }
 0x1d1   : > { %v982_v13 = vadd.f32 %v981_v10, %v933_v15 }
 0x1d3   : > { %v1020_v16 = vmax.f32 %v982_v13, 0.0 }
 0x1d5   : > { %v1035_v17 = vpack.c.bf16 %v1020_v16, %v1019_v14 }
 0x1d6   : > { %v935_v18 = vpop.f32.mrf.mxu3  ;;  %v984_v19 = vpop.f32.mrf.mxu0 }
 0x1d7   : > { %1119 = vmatmul.bf16.vlgmr.msrb.gmra.mxu1 %v1035_v17  ;;  %v936_v20 = vadd.f32 %v1887_v7, %v935_v18 }
 0x1d9   : > { %v985_v23 = vadd.f32 %v984_v19, %v936_v20 }
 0x1db   : > { %v1021_v26 = vmax.f32 %v985_v23, 0.0 }
 0x1de   : > { %v937_v21 = vpop.f32.mrf.mxu3  ;;  %v986_v22 = vpop.f32.mrf.mxu0 }
 0x1df   : > { %v938_v24 = vadd.f32 %v1887_v7, %v937_v21 }
 0x1e1   : > { %v987_v25 = vadd.f32 %v986_v22, %v938_v24 }
 0x1e3   : > { %v1022_v27 = vmax.f32 %v987_v25, 0.0 }
 0x1e5   : > { %v1036_v28 = vpack.c.bf16 %v1022_v27, %v1021_v26 }
 0x1e6   : > { %v940_v29 = vpop.f32.mrf.mxu3  ;;  %v989_v30 = vpop.f32.mrf.mxu0 }
 0x1e7   : > { %1124 = vmatmul.bf16.gmra.mxu1 %v1036_v28  ;;  %v941_v31 = vadd.f32 %v1887_v7, %v940_v29 }
 0x1e9   : > { %v990_v34 = vadd.f32 %v989_v30, %v941_v31 }
 0x1eb   : > { %v1023_v37 = vmax.f32 %v990_v34, 0.0 }
 0x1ee   : > { %v942_v32 = vpop.f32.mrf.mxu3  ;;  %v991_v33 = vpop.f32.mrf.mxu0 }
 0x1ef   : > { %v943_v35 = vadd.f32 %v1887_v7, %v942_v32  ;;  %v1549_v32 = vld [vmem:[%s1941_s8] ss:$0 sm:$0xff] }
 0x1f1   : > { %v992_v36 = vadd.f32 %v991_v33, %v943_v35 }
 0x1f3   : > { %v1024_v38 = vmax.f32 %v992_v36, 0.0 }
 0x1f5   : > { %v1037_v39 = vpack.c.bf16 %v1024_v38, %v1023_v37 }
 0x1f6   : > { %v945_v40 = vpop.f32.mrf.mxu3  ;;  %v994_v41 = vpop.f32.mrf.mxu0 }
 0x1f7   : > { %1129 = vmatmul.bf16.gmra.mxu1 %v1037_v39  ;;  %v946_v42 = vadd.f32 %v1887_v7, %v945_v40 }
 0x1f9   : > { %v995_v45 = vadd.f32 %v994_v41, %v946_v42 }
 0x1fb   : > { %v1025_v48 = vmax.f32 %v995_v45, 0.0 }
 0x1fe   : > { %v947_v43 = vpop.f32.mrf.mxu3  ;;  %v996_v44 = vpop.f32.mrf.mxu0 }
 0x1ff   : > { %v948_v46 = vadd.f32 %v1887_v7, %v947_v43 }
 0x201   : > { %v997_v47 = vadd.f32 %v996_v44, %v948_v46 }
 0x203   : > { %v1026_v49 = vmax.f32 %v997_v47, 0.0 }
 0x205   : > { %v1038_v50 = vpack.c.bf16 %v1026_v49, %v1025_v48 }
 0x206   : > { %v950_v51 = vpop.f32.mrf.mxu3  ;;  %v999_v52 = vpop.f32.mrf.mxu0 }
 0x207   : > { %1134 = vmatmul.bf16.gmra.mxu1 %v1038_v50  ;;  %v951_v53 = vadd.f32 %v1887_v7, %v950_v51 }
 0x209   : > { %v1000_v56 = vadd.f32 %v999_v52, %v951_v53 }
 0x20b   : > { %v1027_v59 = vmax.f32 %v1000_v56, 0.0 }
 0x20e   : > { %v952_v54 = vpop.f32.mrf.mxu3  ;;  %v1001_v55 = vpop.f32.mrf.mxu0 }
 0x20f   : > { %v953_v57 = vadd.f32 %v1887_v7, %v952_v54 }
 0x211   : > { %v1002_v58 = vadd.f32 %v1001_v55, %v953_v57 }
 0x213   : > { %v1028_v60 = vmax.f32 %v1002_v58, 0.0 }
 0x215   : > { %v1039_v61 = vpack.c.bf16 %v1028_v60, %v1027_v59 }
 0x216   : > { %v955_v62 = vpop.f32.mrf.mxu3  ;;  %v1004_v63 = vpop.f32.mrf.mxu0 }
 0x217   : > { %1139 = vmatmul.bf16.gmra.mxu1 %v1039_v61  ;;  %v956_v0 = vadd.f32 %v1887_v7, %v955_v62 }
 0x219   : > { %v1005_v11 = vadd.f32 %v1004_v63, %v956_v0 }
 0x21b   : > { %v1029_v5 = vmax.f32 %v1005_v11, 0.0 }
 0x21e   : > { %v957_v1 = vpop.f32.mrf.mxu3  ;;  %v1006_v2 = vpop.f32.mrf.mxu0 }
 0x21f   : > { %v958_v3 = vadd.f32 %v1887_v7, %v957_v1 }
 0x221   : > { %v1007_v4 = vadd.f32 %v1006_v2, %v958_v3 }
 0x223   : > { %v1030_v6 = vmax.f32 %v1007_v4, 0.0 }
 0x225   : > { %v1040_v8 = vpack.c.bf16 %v1030_v6, %v1029_v5 }
 0x226   : > { %v960_v9 = vpop.f32.mrf.mxu3  ;;  %v1009_v10 = vpop.f32.mrf.mxu0 }
 0x227   : > { %1144 = vmatmul.bf16.gmra.mxu1 %v1040_v8  ;;  %v961_v12 = vadd.f32 %v1887_v7, %v960_v9 }
 0x229   : > { %v1010_v14 = vadd.f32 %v1009_v10, %v961_v12 }
 0x22b   : > { %v1031_v18 = vmax.f32 %v1010_v14, 0.0 }
 0x22e   : > { %v962_v15 = vpop.f32.mrf.mxu3  ;;  %v1011_v13 = vpop.f32.mrf.mxu0 }
 0x22f   : > { %v963_v16 = vadd.f32 %v1887_v7, %v962_v15 }
 0x231   : > { %v1012_v17 = vadd.f32 %v1011_v13, %v963_v16 }
 0x233   : > { %v1032_v19 = vmax.f32 %v1012_v17, 0.0 }
 0x235   : > { %v1041_v20 = vpack.c.bf16 %v1032_v19, %v1031_v18 }
 0x236   : > { %v965_v21 = vpop.f32.mrf.mxu3  ;;  %v1014_v22 = vpop.f32.mrf.mxu0 }
 0x237   : > { %1149 = vmatmul.bf16.gmra.mxu1 %v1041_v20  ;;  %v966_v23 = vadd.f32 %v1887_v7, %v965_v21 }
 0x239   : > { %v1015_v25 = vadd.f32 %v1014_v22, %v966_v23 }
 0x23b   : > { %v1033_v29 = vmax.f32 %v1015_v25, 0.0 }
 0x23e   : > { %v967_v24 = vpop.f32.mrf.mxu3  ;;  %v1016_v27 = vpop.f32.mrf.mxu0 }
 0x23f   : > { %v968_v26 = vadd.f32 %v1887_v7, %v967_v24 }
 0x241   : > { %v1017_v28 = vadd.f32 %v1016_v27, %v968_v26 }
 0x243   : > { %v1034_v30 = vmax.f32 %v1017_v28, 0.0 }
 0x245   : > { %v1042_v31 = vpack.c.bf16 %v1034_v30, %v1033_v29 }
 0x247   : > { %1154 = vmatmul.bf16.gmra.mxu1 %v1042_v31 }
 0x254   : > { %v1120_v7 = vpop.f32.mrf.mxu1 }
 0x255   : > { %v1121_v33 = vadd.f32 %v1549_v32, %v1120_v7 }
 0x257   : > { %1160 = vst [vmem:[%s1912_s24] sm:$0xff] %v1121_v33 }
 0x25c   : > { %v1122_v34 = vpop.f32.mrf.mxu1 }
 0x25d   : > { %v1123_v35 = vadd.f32 %v1549_v32, %v1122_v34 }
 0x25f   : > { %1161 = vst [vmem:[%s1912_s24 + $0x8] sm:$0xff] %v1123_v35 }
 0x264   : > { %v1125_v36 = vpop.f32.mrf.mxu1 }
 0x265   : > { %v1126_v37 = vadd.f32 %v1549_v32, %v1125_v36 }
 0x267   : > { %1162 = vst [vmem:[%s1912_s24 + $0x10] sm:$0xff] %v1126_v37 }
 0x26c   : > { %v1127_v38 = vpop.f32.mrf.mxu1 }
 0x26d   : > { %v1128_v39 = vadd.f32 %v1549_v32, %v1127_v38 }
 0x26f   : > { %1163 = vst [vmem:[%s1912_s24 + $0x18] sm:$0xff] %v1128_v39 }
 0x274   : > { %v1130_v40 = vpop.f32.mrf.mxu1 }
 0x275   : > { %v1131_v41 = vadd.f32 %v1549_v32, %v1130_v40 }
 0x277   : > { %1164 = vst [vmem:[%s1912_s24 + $0x20] sm:$0xff] %v1131_v41 }
 0x27c   : > { %v1132_v42 = vpop.f32.mrf.mxu1 }
 0x27d   : > { %v1133_v43 = vadd.f32 %v1549_v32, %v1132_v42 }
 0x27f   : > { %1165 = vst [vmem:[%s1912_s24 + $0x28] sm:$0xff] %v1133_v43 }
 0x284   : > { %v1135_v44 = vpop.f32.mrf.mxu1 }
 0x285   : > { %v1136_v45 = vadd.f32 %v1549_v32, %v1135_v44 }
 0x287   : > { %1166 = vst [vmem:[%s1912_s24 + $0x30] sm:$0xff] %v1136_v45 }
 0x28c   : > { %v1137_v46 = vpop.f32.mrf.mxu1 }
 0x28d   : > { %v1138_v47 = vadd.f32 %v1549_v32, %v1137_v46 }
 0x28f   : > { %1167 = vst [vmem:[%s1912_s24 + $0x38] sm:$0xff] %v1138_v47 }
 0x294   : > { %v1140_v48 = vpop.f32.mrf.mxu1 }
 0x295   : > { %v1141_v49 = vadd.f32 %v1549_v32, %v1140_v48 }
 0x297   : > { %1168 = vst [vmem:[%s1912_s24 + $0x40] sm:$0xff] %v1141_v49 }
 0x29c   : > { %v1142_v50 = vpop.f32.mrf.mxu1 }
 0x29d   : > { %v1143_v51 = vadd.f32 %v1549_v32, %v1142_v50 }
 0x29f   : > { %1169 = vst [vmem:[%s1912_s24 + $0x48] sm:$0xff] %v1143_v51 }
 0x2a4   : > { %v1145_v52 = vpop.f32.mrf.mxu1 }
 0x2a5   : > { %v1146_v53 = vadd.f32 %v1549_v32, %v1145_v52 }
 0x2a7   : > { %1170 = vst [vmem:[%s1912_s24 + $0x50] sm:$0xff] %v1146_v53 }
 0x2ac   : > { %v1147_v54 = vpop.f32.mrf.mxu1 }
 0x2ad   : > { %v1148_v55 = vadd.f32 %v1549_v32, %v1147_v54 }
 0x2af   : > { %1171 = vst [vmem:[%s1912_s24 + $0x58] sm:$0xff] %v1148_v55 }
 0x2b4   : > { %v1150_v56 = vpop.f32.mrf.mxu1 }
 0x2b5   : > { %v1151_v57 = vadd.f32 %v1549_v32, %v1150_v56 }
 0x2b7   : > { %1172 = vst [vmem:[%s1912_s24 + $0x60] sm:$0xff] %v1151_v57 }
 0x2bc   : > { %v1152_v58 = vpop.f32.mrf.mxu1 }
 0x2bd   : > { %v1153_v59 = vadd.f32 %v1549_v32, %v1152_v58 }
 0x2bf   : > { %1173 = vst [vmem:[%s1912_s24 + $0x68] sm:$0xff] %v1153_v59 }
 0x2c4   : > { %v1155_v60 = vpop.f32.mrf.mxu1 }
 0x2c5   : > { %v1156_v61 = vadd.f32 %v1549_v32, %v1155_v60 }
 0x2c7   : > { %1174 = vst [vmem:[%s1912_s24 + $0x70] sm:$0xff] %v1156_v61 }
 0x2cc   : > { %v1157_v62 = vpop.f32.mrf.mxu1 }
 0x2cd   : > { %v1158_v63 = vadd.f32 %v1549_v32, %v1157_v62 }
 0x2cf   : > { %1175 = vst [vmem:[%s1912_s24 + $0x78] sm:$0xff] %v1158_v63 }
 0x2d0 PF: > { %s19_s30 = sadd.s32 1, %s1556_s30  }
 0x2d1   : > { %p16_p4 = scmp.ge.s32.totalorder %s19_s30, 5  }
 0x2d3   :  { %18 = sbr.rel (!%p16_p4) target bundleno = 1 (0x1), region = 86 }

</bundles_post_ra>
